<compile_context>
chip_gen: v6e
topology: v6e:2x2x1
jax: 0.10.0
libtpu: 0.0.40
codegen_flags: <defaults>
</compile_context>

<pallas_src>
import functools
import math

import jax
import jax.numpy as jnp
from jax.experimental import pallas as pl
from jax.experimental.pallas import tpu as pltpu

_LANES = 128
_BLOCK_BYTES_PER_INPUT = 4 * 1024 * 1024   # ~4 MiB of the larger-dtype input per step
_NUM_CHUNKS = 2                            # "parallel" axis; shards across v7x's 2 TCs
_VMEM_MARGIN = 8 * 1024 * 1024
_VMEM_FLOOR = 16 * 1024 * 1024
_VMEM_CAP = 48 * 1024 * 1024


def _pow(x, p: float):
    """x**p with cheap VPU special cases for small integer p (x >= 0)."""
    if p == 1.0:
        return x
    if p == 2.0:
        return x * x
    if p == 3.0:
        return x * x * x
    if p == 4.0:
        x2 = x * x
        return x2 * x2
    return jnp.power(x, jnp.float32(p))


def _dice_partial_kernel(probs_ref, labels_ref, numer_ref, denor_ref, *,
                         p: float, rows: int, block_rows: int, steps: int,
                         n_blocks: int, needs_mask: bool):
    s = pl.program_id(1)

    @pl.when(s == 0)
    def _():
        numer_ref[...] = jnp.zeros_like(numer_ref)
        denor_ref[...] = jnp.zeros_like(denor_ref)

    pr = probs_ref[...].astype(jnp.float32)   # (block_rows, 128)
    lb = labels_ref[...].astype(jnp.float32)

    def _accumulate(pr_v, lb_v):
        prod = pr_v * lb_v                     # -> numerator sum
        powsum = _pow(pr_v, p) + _pow(lb_v, p)  # -> denominator sum
        # Sublane-only reductions into per-lane partials (XLU slot); the
        # cross-lane reduce is deferred to the wrapper.
        # (A ones-vector MXU matmul could replace these sums if a bundle dump
        #  ever shows the VALU slot binding for bf16 on v7x; not needed here.)
        numer_ref[...] += jnp.sum(prod, axis=0, keepdims=True)
        denor_ref[...] += jnp.sum(powsum, axis=0, keepdims=True)

    if not needs_mask:
        _accumulate(pr, lb)
    else:
        c = pl.program_id(0)
        blk = c * steps + s   # unclamped logical block id

        # Steady state: all blocks before the last real one are always full.
        @pl.when(blk < n_blocks - 1)
        def _():
            _accumulate(pr, lb)

        # Tail: last real block (possibly ragged / partially out-of-bounds)
        # plus clamped duplicate blocks (fully masked out).  Mask BEFORE any
        # arithmetic so undefined OOB rows cannot inject NaN/Inf.
        @pl.when(blk >= n_blocks - 1)
        def _():
            row_ids = blk * block_rows + jax.lax.broadcasted_iota(
                jnp.int32, pr.shape, 0)
            valid = row_ids < rows
            zero = jnp.float32(0.0)
            _accumulate(jnp.where(valid, pr, zero), jnp.where(valid, lb, zero))


def soft_dice_loss_v2(outputs: jax.Array, targets: jax.Array,
                      p: float = 1.0, smooth: float = 1.0,
                      *, block_rows_cap=None) -> jax.Array:
    """Soft-Dice loss (forward). Returns a (1,) float32 tensor. Requires p > 0.

    `block_rows_cap` is a tuning/testing knob overriding the per-step block
    height (rounded down to the dtype's sublane packing multiple).
    """
    p = float(p)
    # Pallas refs want a numeric dtype; bool -> uint8 only.  All other dtypes
    # (bf16, f32, int8/32 labels) stream natively and are cast in-kernel.
    if outputs.dtype == jnp.bool_:
        outputs = outputs.astype(jnp.uint8)
    if targets.dtype == jnp.bool_:
        targets = targets.astype(jnp.uint8)

    n = math.prod(outputs.shape)
    probs = outputs.reshape(-1)    # free reshape, keep native dtype
    labels = targets.reshape(-1)

    rem = n % _LANES
    main = n - rem

    # Lane-misaligned tail (< 128 elements): tiny XLA reduction, no full pad.
    tail_numer = jnp.float32(0.0)
    tail_denor = jnp.float32(0.0)
    if rem:
        tp = probs[main:].astype(jnp.float32)
        tl = labels[main:].astype(jnp.float32)
        tail_numer = jnp.sum(tp * tl)
        tail_denor = jnp.sum(_pow(tp, p) + _pow(tl, p))

    smooth_f = jnp.float32(smooth)
    if main == 0:
        # Degenerate tiny input (< 128 elements): plain XLA, same semantics.
        numer = 2.0 * tail_numer + smooth_f
        denor = tail_denor + smooth_f
        return (jnp.float32(1.0) - numer / denor).reshape(1)

    if rem:
        probs = probs[:main]
        labels = labels[:main]

    rows = main // _LANES
    probs2d = probs.reshape(rows, _LANES)
    labels2d = labels.reshape(rows, _LANES)

    item_p = jnp.dtype(probs2d.dtype).itemsize
    item_l = jnp.dtype(labels2d.dtype).itemsize
    # Sub-32-bit dtypes pack along sublanes: f32 -> 8, bf16 -> 16, int8 -> 32.
    row_align = 32 // min(item_p, item_l)
    cap = _BLOCK_BYTES_PER_INPUT // (_LANES * max(item_p, item_l))
    if block_rows_cap is not None:
        cap = max(row_align, (int(block_rows_cap) // row_align) * row_align)

    block_rows = rows if rows <= cap else cap
    n_blocks = pl.cdiv(rows, block_rows)
    num_chunks = min(_NUM_CHUNKS, n_blocks)
    steps = pl.cdiv(n_blocks, num_chunks)
    # Mask only if the (chunks * steps) block slots over-cover the real rows
    # (ragged last block and/or clamped duplicate tail blocks).
    needs_mask = (num_chunks * steps * block_rows) != rows

    def in_map(c, s):
        # Clamp so the index map never points past the last real block; any
        # duplicated tail block is fully masked out in the kernel.
        return (jnp.minimum(c * steps + s, n_blocks - 1), 0)

    def out_map(c, s):
        return (c, 0, 0)

    kernel = functools.partial(
        _dice_partial_kernel, p=p, rows=rows, block_rows=block_rows,
        steps=steps, n_blocks=n_blocks, needs_mask=needs_mask)

    # Double-buffered input footprint; set the scoped-VMEM limit to cover it
    # with headroom (v5e default is only ~16 MiB).
    in_vmem = 2 * block_rows * _LANES * (item_p + item_l)
    vmem_limit = int(min(max(in_vmem + _VMEM_MARGIN, _VMEM_FLOOR), _VMEM_CAP))

    elem = rows * _LANES
    cost = pl.CostEstimate(
        flops=5 * elem,
        transcendentals=0 if p in (1.0, 2.0, 3.0, 4.0) else 2 * elem,
        bytes_accessed=elem * (item_p + item_l) + 2 * num_chunks * _LANES * 4,
    )

    numer_part, denor_part = pl.pallas_call(
        kernel,
        out_shape=(
            jax.ShapeDtypeStruct((num_chunks, 1, _LANES), jnp.float32),
            jax.ShapeDtypeStruct((num_chunks, 1, _LANES), jnp.float32),
        ),
        grid_spec=pltpu.PrefetchScalarGridSpec(
            num_scalar_prefetch=0,
            grid=(num_chunks, steps),
            in_specs=[
                pl.BlockSpec((block_rows, _LANES), in_map),
                pl.BlockSpec((block_rows, _LANES), in_map),
            ],
            out_specs=[
                # Leading chunk dim squeezed out of the kernel view -> (1, 128).
                pl.BlockSpec((None, 1, _LANES), out_map),
                pl.BlockSpec((None, 1, _LANES), out_map),
            ],
        ),
        compiler_params=pltpu.CompilerParams(
            dimension_semantics=("parallel", "arbitrary"),
            vmem_limit_bytes=vmem_limit,
        ),
        cost_estimate=cost,
    )(probs2d, labels2d)

    # Tiny final combine (a few hundred floats + a division) in plain XLA.
    numer = 2.0 * (jnp.sum(numer_part) + tail_numer) + smooth_f
    denor = jnp.sum(denor_part) + tail_denor + smooth_f
    loss = jnp.float32(1.0) - numer / denor
    return loss.reshape(1)   # matches PyTorch output shape (1,)


# TODO(synk): the module's custom backward (SoftDiceLossV2Func.backward) is not
# implemented here; only the forward pass was requested.


def _reference(outputs, targets, p=1.0, smooth=1.0):
    pr = outputs.reshape(1, -1).astype(jnp.float32)
    lb = targets.reshape(1, -1).astype(jnp.float32)
    numer = 2.0 * jnp.sum(pr * lb, axis=1) + smooth
    denor = jnp.sum(jnp.power(pr, p) + jnp.power(lb, p), axis=1) + smooth
    return 1.0 - numer / denor


if __name__ == "__main__":
    key = jax.random.PRNGKey(0)
    k1, k2, k3, k4, k5, k6 = jax.random.split(key, 6)

    # Case 1: lane-aligned f32 (N, C, H, W) probabilities, binary labels.
    x1 = jax.nn.sigmoid(jax.random.normal(k1, (2, 4, 16, 16), jnp.float32))
    y1 = (jax.random.uniform(k2, (2, 4, 16, 16)) > 0.5).astype(jnp.float32)
    l1 = jax.block_until_ready(soft_dice_loss_v2(x1, y1, p=1.0, smooth=1.0))
    r1 = _reference(x1, y1, p=1.0, smooth=1.0)
    assert l1.shape == (1,), l1.shape
    assert jnp.allclose(l1, r1, rtol=1e-5, atol=1e-6), (l1, r1)

    # Case 2: bf16 probs + int32 labels with a tiny forced block cap, so the
    # grid has clamped duplicate blocks and the gated mask path is exercised.
    x2 = jax.nn.sigmoid(
        jax.random.normal(k3, (3, 4, 16, 32), jnp.float32)).astype(jnp.bfloat16)
    y2 = (jax.random.uniform(k4, (3, 4, 16, 32)) > 0.5).astype(jnp.int32)
    l2 = jax.block_until_ready(
        soft_dice_loss_v2(x2, y2, p=2.0, smooth=1.0, block_rows_cap=16))
    r2 = _reference(x2, y2, p=2.0, smooth=1.0)
    assert jnp.allclose(l2, r2, rtol=1e-4, atol=1e-5), (l2, r2)

    # Case 3: lane-misaligned f32 input (XLA tail path) + ragged last block.
    x3 = jax.nn.sigmoid(jax.random.normal(k5, (2, 4, 17, 17), jnp.float32))
    y3 = (jax.random.uniform(k6, (2, 4, 17, 17)) > 0.5).astype(jnp.float32)
    l3 = jax.block_until_ready(
        soft_dice_loss_v2(x3, y3, p=1.0, smooth=1.0, block_rows_cap=8))
    r3 = _reference(x3, y3, p=1.0, smooth=1.0)
    assert jnp.allclose(l3, r3, rtol=1e-5, atol=1e-6), (l3, r3)

    print("KERNEL_OK")
</pallas_src>

<mosaic_0001>
module attributes {stable_mosaic.version = 11 : i64} {
  func.func @_dice_partial_kernel(%arg0: i32, %arg1: i32, %arg2: memref<16x128xf32, #tpu.memory_space<vmem>>, %arg3: memref<16x128xf32, #tpu.memory_space<vmem>>, %arg4: memref<1x1x128xf32, #tpu.memory_space<vmem>>, %arg5: memref<1x1x128xf32, #tpu.memory_space<vmem>>) attributes {dimension_semantics = [#tpu.dimension_semantics<parallel>, #tpu.dimension_semantics<arbitrary>], iteration_bounds = array<i64: 1, 1>, scalar_prefetch = 0 : i64, scratch_operands = 0 : i64, tpu.core_type = #tpu.core_type<tc>, window_params = [{transform_indices = @transform_0, window_bounds = array<i64: 16, 128>}, {transform_indices = @transform_1, window_bounds = array<i64: 16, 128>}, {transform_indices = @transform_2, window_bounds = array<i64: 1, 1, 128>}, {transform_indices = @transform_3, window_bounds = array<i64: 1, 1, 128>}]} {
    %c0_i32 = arith.constant 0 : i32
    %0 = arith.cmpi eq, %arg1, %c0_i32 : i32
    %1 = arith.extui %0 : i1 to i32
    %c0_i32_0 = arith.constant 0 : i32
    %2 = arith.cmpi ne, %1, %c0_i32_0 : i32
    scf.if %2 {
      %cst_17 = arith.constant 0.000000e+00 : f32
      %23 = vector.broadcast %cst_17 : f32 to vector<1x128xf32>
      %c0_18 = arith.constant 0 : index
      %c0_19 = arith.constant 0 : index
      %c0_20 = arith.constant 0 : index
      %24 = vector.load %arg4[%c0_18, %c0_19, %c0_20] : memref<1x1x128xf32, #tpu.memory_space<vmem>>, vector<1x1x128xf32>
      %25 = vector.shape_cast %24 : vector<1x1x128xf32> to vector<1x128xf32>
      %26 = vector.shape_cast %23 : vector<1x128xf32> to vector<1x1x128xf32>
      tpu.vector_store %arg4[%c0_18, %c0_19, %c0_20], %26 {strides = array<i32>} : memref<1x1x128xf32, #tpu.memory_space<vmem>>, vector<1x1x128xf32>,
      %cst_21 = arith.constant 0.000000e+00 : f32
      %27 = vector.broadcast %cst_21 : f32 to vector<1x128xf32>
      %c0_22 = arith.constant 0 : index
      %c0_23 = arith.constant 0 : index
      %c0_24 = arith.constant 0 : index
      %28 = vector.load %arg5[%c0_22, %c0_23, %c0_24] : memref<1x1x128xf32, #tpu.memory_space<vmem>>, vector<1x1x128xf32>
      %29 = vector.shape_cast %28 : vector<1x1x128xf32> to vector<1x128xf32>
      %30 = vector.shape_cast %27 : vector<1x128xf32> to vector<1x1x128xf32>
      tpu.vector_store %arg5[%c0_22, %c0_23, %c0_24], %30 {strides = array<i32>} : memref<1x1x128xf32, #tpu.memory_space<vmem>>, vector<1x1x128xf32>,
    } else {
    }
    %c0 = arith.constant 0 : index
    %c0_1 = arith.constant 0 : index
    %3 = vector.load %arg2[%c0, %c0_1] : memref<16x128xf32, #tpu.memory_space<vmem>>, vector<16x128xf32>
    %c0_2 = arith.constant 0 : index
    %c0_3 = arith.constant 0 : index
    %4 = vector.load %arg3[%c0_2, %c0_3] : memref<16x128xf32, #tpu.memory_space<vmem>>, vector<16x128xf32>
    %5 = arith.mulf %3, %4 : vector<16x128xf32>
    %6 = arith.addf %3, %4 : vector<16x128xf32>
    %c0_4 = arith.constant 0 : index
    %c0_5 = arith.constant 0 : index
    %c0_6 = arith.constant 0 : index
    %7 = vector.load %arg4[%c0_4, %c0_5, %c0_6] : memref<1x1x128xf32, #tpu.memory_space<vmem>>, vector<1x1x128xf32>
    %8 = vector.shape_cast %7 : vector<1x1x128xf32> to vector<1x128xf32>
    %cst = arith.constant dense<0.000000e+00> : vector<128xf32>
    %9 = vector.multi_reduction <add>, %5, %cst [0] : vector<16x128xf32> to vector<128xf32>
    %10 = vector.shape_cast %9 : vector<128xf32> to vector<1x128xf32>
    %11 = arith.addf %8, %10 : vector<1x128xf32>
    %c0_7 = arith.constant 0 : index
    %c0_8 = arith.constant 0 : index
    %c0_9 = arith.constant 0 : index
    %12 = vector.load %arg4[%c0_7, %c0_8, %c0_9] : memref<1x1x128xf32, #tpu.memory_space<vmem>>, vector<1x1x128xf32>
    %13 = vector.shape_cast %12 : vector<1x1x128xf32> to vector<1x128xf32>
    %14 = vector.shape_cast %11 : vector<1x128xf32> to vector<1x1x128xf32>
    tpu.vector_store %arg4[%c0_7, %c0_8, %c0_9], %14 {strides = array<i32>} : memref<1x1x128xf32, #tpu.memory_space<vmem>>, vector<1x1x128xf32>,
    %c0_10 = arith.constant 0 : index
    %c0_11 = arith.constant 0 : index
    %c0_12 = arith.constant 0 : index
    %15 = vector.load %arg5[%c0_10, %c0_11, %c0_12] : memref<1x1x128xf32, #tpu.memory_space<vmem>>, vector<1x1x128xf32>
    %16 = vector.shape_cast %15 : vector<1x1x128xf32> to vector<1x128xf32>
    %cst_13 = arith.constant dense<0.000000e+00> : vector<128xf32>
    %17 = vector.multi_reduction <add>, %6, %cst_13 [0] : vector<16x128xf32> to vector<128xf32>
    %18 = vector.shape_cast %17 : vector<128xf32> to vector<1x128xf32>
    %19 = arith.addf %16, %18 : vector<1x128xf32>
    %c0_14 = arith.constant 0 : index
    %c0_15 = arith.constant 0 : index
    %c0_16 = arith.constant 0 : index
    %20 = vector.load %arg5[%c0_14, %c0_15, %c0_16] : memref<1x1x128xf32, #tpu.memory_space<vmem>>, vector<1x1x128xf32>
    %21 = vector.shape_cast %20 : vector<1x1x128xf32> to vector<1x128xf32>
    %22 = vector.shape_cast %19 : vector<1x128xf32> to vector<1x1x128xf32>
    tpu.vector_store %arg5[%c0_14, %c0_15, %c0_16], %22 {strides = array<i32>} : memref<1x1x128xf32, #tpu.memory_space<vmem>>, vector<1x1x128xf32>,
    return
  }
  func.func @transform_0(%arg0: i32, %arg1: i32) -> (i32, i32) {
    %c1_i32 = arith.constant 1 : i32
    %0 = arith.muli %arg0, %c1_i32 : i32
    %1 = arith.addi %0, %arg1 : i32
    %c0_i32 = arith.constant 0 : i32
    %2 = arith.minsi %1, %c0_i32 : i32
    %c0_i32_0 = arith.constant 0 : i32
    %c0_i32_1 = arith.constant 0 : i32
    return %2, %c0_i32_0 : i32, i32
  }
  func.func @transform_1(%arg0: i32, %arg1: i32) -> (i32, i32) {
    %c1_i32 = arith.constant 1 : i32
    %0 = arith.muli %arg0, %c1_i32 : i32
    %1 = arith.addi %0, %arg1 : i32
    %c0_i32 = arith.constant 0 : i32
    %2 = arith.minsi %1, %c0_i32 : i32
    %c0_i32_0 = arith.constant 0 : i32
    %c0_i32_1 = arith.constant 0 : i32
    return %2, %c0_i32_0 : i32, i32
  }
  func.func @transform_2(%arg0: i32, %arg1: i32) -> (i32, i32, i32) {
    %c0_i32 = arith.constant 0 : i32
    %c0_i32_0 = arith.constant 0 : i32
    %c0_i32_1 = arith.constant 0 : i32
    return %arg0, %c0_i32, %c0_i32_0 : i32, i32, i32
  }
  func.func @transform_3(%arg0: i32, %arg1: i32) -> (i32, i32, i32) {
    %c0_i32 = arith.constant 0 : i32
    %c0_i32_0 = arith.constant 0 : i32
    %c0_i32_1 = arith.constant 0 : i32
    return %arg0, %c0_i32, %c0_i32_0 : i32, i32, i32
  }
}

</mosaic_0001>

<bundles_post_ra>
// kernel: tpu_custom_call.1
= control target key start
LH: loop header
LB: loop body
LE: loop exit
PB: predicated region body
PF: predicated region fallthrough
CT: control target
= control target key end

     0   :  { %9 = vsyncpa [#allocation3], 0  ;;  %s265_s0 = inlined_call_operand.hbm [shape: f32[16,128], index: 0, kind: input, shape index: {}]   ;;  %s266_s1 = inlined_call_operand.hbm [shape: f32[16,128], index: 1, kind: input, shape index: {}]   ;;  %s267_s2 = inlined_call_operand.hbm [shape: f32[1,1,128], index: 2, kind: output, shape index: {0}]   ;;  %s268_s3 = inlined_call_operand.hbm [shape: f32[1,1,128], index: 3, kind: output, shape index: {1}]  }
   0x1   :  { %10 = vsyncpa [#allocation6], 0 }
   0x2   :  { %11 = vsyncpa [#allocation4], 0 }
   0x3   :  { %12 = vsyncpa [#allocation9], 0  ;;  %s226_s12 = smov [#allocation2]  }
   0x4   :  { %s24_s13 = sshll.u32 %s226_s12, 4  ;;  %s25_s13 = int_to_ptr.vmem [resolvable:$true] %s24_s13 }
   0x5   :  { %s146_s14 = scalar_lea.vmem %s25_s13, 256  ;;  %p151_p1 = scmp.lt.s32.totalorder %s25_s13, %s25_s13 }
   0x6   :  { %p147_p0 = scmp.ne.s32.totalorder %s25_s13, %s146_s14  ;;  %p152_p2 = scmp.lt.s32.totalorder %s146_s14, %s146_s14 }
   0x8   :  { %p153_p3 = por %p152_p2, %p151_p1 }
   0xa   :  { %p154_p4 = pnand %p153_p3, %p147_p0 }
   0xc   :  { %157 = shalt.err (!%p154_p4)
}
   0xd   :  { %s227_s15 = smov 128   ;;  %s228_s16 = smov 8  }
   0xe   :  { %30 = dma.hbm_to_vmem [thread:$0]  %s265_s0, 256, %s25_s13, [#allocation3], %s227_s15, %s227_s15, %s228_s16  }
   0xf   :  { %s229_s19 = smov [#allocation5]  }
  0x10   :  { %s42_s20 = sshll.u32 %s229_s19, 4  ;;  %s43_s20 = int_to_ptr.vmem [resolvable:$true] %s42_s20 }
  0x11   :  { %s166_s21 = scalar_lea.vmem %s43_s20, 256  ;;  %p171_p6 = scmp.lt.s32.totalorder %s43_s20, %s43_s20 }
  0x12   :  { %p167_p5 = scmp.ne.s32.totalorder %s43_s20, %s166_s21  ;;  %p172_p7 = scmp.lt.s32.totalorder %s166_s21, %s166_s21 }
  0x14   :  { %p173_p8 = por %p172_p7, %p171_p6 }
  0x16   :  { %p174_p9 = pnand %p173_p8, %p167_p5 }
  0x18   :  { %177 = shalt.err (!%p174_p9)
}
  0x19   :  { %48 = dma.hbm_to_vmem [thread:$0]  %s266_s1, 256, %s43_s20, [#allocation6], %s227_s15, %s227_s15, %s228_s16  }
  0x1a   :  { %218 = dma.done.wait [#allocation3], 256  }
  0x1b   :  { %219 = vsyncadd [#allocation3], 4294967040 }
  0x1c   :  { %220 = dma.done.wait [#allocation6], 256  }
  0x1d   :  { %221 = vsyncadd [#allocation6], 4294967040  ;;  %v230_v0 = vmov 0.0   ;;  %v69_v1 = vld [vmem:[#allocation2] sm:$0xff]  ;;  %v70_v2 = vld [vmem:[#allocation2 + $0x8] sm:$0xff]  ;;  %s231_s0 = smov [#allocation7]  }
  0x1e   :  { %67 = vst [vmem:[#allocation7] sm:$0x1] %v230_v0  ;;  %68 = vst [vmem:[#allocation8] sm:$0x1] %v230_v0  ;;  %v71_v3 = vld [vmem:[#allocation5] sm:$0xff]  ;;  %v72_v4 = vld [vmem:[#allocation5 + $0x8] sm:$0xff] }
  0x1f   :  { %v73_v5 = vmul.f32 %v71_v3, %v69_v1  ;;  %v75_v6 = vadd.f32 %v71_v3, %v69_v1  ;;  %v74_v7 = vmul.f32 %v72_v4, %v70_v2  ;;  %v76_v8 = vadd.f32 %v72_v4, %v70_v2  ;;  %s103_s1 = sshll.u32 %s231_s0, 4  ;;  %s232_s24 = smov [#allocation8]   ;;  %s104_s1 = int_to_ptr.vmem [resolvable:$true] %s103_s1 }
  0x20   :  { %s113_s25 = sshll.u32 %s232_s24, 4  ;;  %s178_s26 = scalar_lea.vmem %s104_s1, 16  ;;  %s114_s25 = int_to_ptr.vmem [resolvable:$true] %s113_s25 }
  0x21   :  { %v78_v9 = vadd.f32 %v74_v7, %v73_v5  ;;  %v88_v10 = vadd.f32 %v76_v8, %v75_v6  ;;  %p179_p10 = scmp.ne.s32.totalorder %s104_s1, %s178_s26  ;;  %s182_s27 = scalar_lea.vmem %s104_s1, 32 }
  0x22   :  { %p183_p11 = scmp.lt.s32.totalorder %s104_s1, %s104_s1  ;;  %p184_p12 = scmp.lt.s32.totalorder %s182_s27, %s178_s26 }
  0x23   :  { %v79_v11 = vrot.slane %v78_v9, 4  ;;  %v89_v12 = vrot.slane %v88_v10, 4 }
  0x24   :  { %p185_p13 = por %p184_p12, %p183_p11 }
  0x25   :  { %v80_v13 = vadd.f32 %v79_v11, %v78_v9  ;;  %v90_v14 = vadd.f32 %v89_v12, %v88_v10  ;;  %v77_v21 = vld [vmem:[#allocation7] sm:$0x1]  ;;  %v87_v22 = vld [vmem:[#allocation8] sm:$0x1] }
  0x26   :  { %p186_p0 = pnand %p185_p13, %p179_p10 }
  0x27   :  { %v81_v15 = vrot.slane %v80_v13, 2  ;;  %v91_v16 = vrot.slane %v90_v14, 2 }
  0x29   :  { %v82_v17 = vadd.f32 %v81_v15, %v80_v13  ;;  %v92_v18 = vadd.f32 %v91_v16, %v90_v14 }
  0x2b   :  { %v83_v19 = vrot.slane %v82_v17, 1  ;;  %v93_v20 = vrot.slane %v92_v18, 1 }
  0x2d   :  { %v84_v23 = vadd.f32 %v83_v19, %v82_v17  ;;  %v94_v24 = vadd.f32 %v93_v20, %v92_v18 }
  0x2f   :  { %v85_v25 = vadd.f32 %v84_v23, %v77_v21  ;;  %v95_v26 = vadd.f32 %v94_v24, %v87_v22 }
  0x31   :  { %86 = vst [vmem:[#allocation7] sm:$0x1] %v85_v25  ;;  %96 = vst [vmem:[#allocation8] sm:$0x1] %v95_v26 }
  0x32   :  { %189 = shalt.err (!%p186_p0)
}
  0x33   :  { %106 = dma.vmem_to_hbm [thread:$0]  %s104_s1, 16, %s267_s2, [#allocation4]  }
  0x34   :  { %s198_s30 = scalar_lea.vmem %s114_s25, 16  ;;  %s202_s4 = scalar_lea.vmem %s114_s25, 32 }
  0x35   :  { %p199_p1 = scmp.ne.s32.totalorder %s114_s25, %s198_s30  ;;  %p203_p2 = scmp.lt.s32.totalorder %s114_s25, %s114_s25 }
  0x36   :  { %p204_p3 = scmp.lt.s32.totalorder %s202_s4, %s198_s30 }
  0x38   :  { %p205_p4 = por %p204_p3, %p203_p2 }
  0x3a   :  { %p206_p5 = pnand %p205_p4, %p199_p1 }
  0x3c   :  { %209 = shalt.err (!%p206_p5)
}
  0x3d   :  { %116 = dma.vmem_to_hbm [thread:$0]  %s114_s25, 16, %s268_s3, [#allocation9]  }
  0x3e   :  { %222 = dma.done.wait [#allocation4], 16  }
  0x3f   :  { %223 = vsyncadd [#allocation4], 4294967280 }
  0x40   :  { %224 = dma.done.wait [#allocation9], 16  }
  0x41   :  { %225 = vsyncadd [#allocation9], 4294967280 }
  0x42   :  { %123 = vsyncpa [#allocation3], 1 }
  0x43   :  { %124 = vsyncpa [#allocation6], 1 }
  0x44   :  { %125 = vsyncpa [#allocation4], 1 }
  0x45   :  { %126 = vsyncpa [#allocation9], 1 }

</bundles_post_ra>
